<compile_context>
chip_gen: v6e
topology: v6e:2x2x1
jax: 0.10.0
libtpu: 0.0.40
codegen_flags: <defaults>
</compile_context>

<pallas_src>
import jax
import jax.numpy as jnp
from jax.experimental import pallas as pl
from jax.experimental.pallas import tpu as pltpu

_MAX_BLOCK_BYTES = 8 * 1024 * 1024        # ~8 MiB per block (per buffer)
_VMEM_LIMIT_BYTES = 48 * 1024 * 1024      # 4 x 8 MiB buffers + headroom
_LANE_CANDIDATES = (1024, 512, 384, 256, 128)


def _round_up(v, m):
    return ((v + m - 1) // m) * m


def _round_down(v, m):
    return (v // m) * m


def _relu_kernel(x_ref, o_ref):
    # Pure VPU elementwise max with scalar 0 (keeps vreg pressure minimal).
    o_ref[...] = jnp.maximum(x_ref[...], 0)


def _relu_2d(x2d, block_rows, *, donate=False):
    """Tiled, pipelined ReLU over a lane-dense (rows, lanes) slab."""
    rows, lanes = x2d.shape
    itemsize = jnp.dtype(x2d.dtype).itemsize
    grid = (pl.cdiv(rows, block_rows),)   # ragged last block is masked by Pallas
    return pl.pallas_call(
        _relu_kernel,
        out_shape=jax.ShapeDtypeStruct((rows, lanes), x2d.dtype),
        grid=grid,
        in_specs=[pl.BlockSpec((block_rows, lanes), lambda i: (i, 0))],
        out_specs=pl.BlockSpec((block_rows, lanes), lambda i: (i, 0)),
        compiler_params=pltpu.CompilerParams(
            dimension_semantics=("parallel",),
            vmem_limit_bytes=_VMEM_LIMIT_BYTES,
        ),
        cost_estimate=pl.CostEstimate(
            flops=rows * lanes,
            transcendentals=0,
            bytes_accessed=2 * rows * lanes * itemsize,
        ),
        input_output_aliases={0: 0} if donate else {},
    )(x2d)


def _relu_slab(xf, lanes, sublane, itemsize, *, donate=False):
    """ReLU of a flat array whose length is a multiple of `lanes`."""
    rows = xf.size // lanes
    x2d = xf.reshape(rows, lanes)  # free bitcast: length % lanes == 0

    # Largest block that keeps each DMA ~8 MiB, rounded to full sublanes.
    max_block_rows = max(sublane,
                         _round_down(_MAX_BLOCK_BYTES // (lanes * itemsize), sublane))
    if rows <= sublane:
        # Tiny slab: full-extent block (legal even when rows % sublane != 0).
        block_rows = rows
    else:
        # Aim for >=4 grid steps so v7x's two TensorCores both get work.
        block_rows = min(max_block_rows,
                         max(sublane, _round_up(pl.cdiv(rows, 4), sublane)))
    y2d = _relu_2d(x2d, block_rows, donate=donate)
    return y2d.reshape(-1)


def qrelu_forward(x, *, donate=False):
    """Pallas equivalent of qrelu(qat=False).forward == nn.ReLU.

    Accepts any shape (NCHW etc.). Flattens to a lane-dense slab with an
    adaptively chosen lane width so no whole-array pad/slice copies are needed.
    """
    orig_shape = x.shape
    total = x.size
    if total == 0:
        return x

    itemsize = jnp.dtype(x.dtype).itemsize
    sublane = max(8, 32 // itemsize)   # 8 f32 / 16 bf16 / 32 int8,fp8

    xf = jnp.ravel(x)

    # Adaptive lane width: largest multiple of 128 (<=1024) dividing total.
    lanes = None
    for cand in _LANE_CANDIDATES:
        if total % cand == 0:
            lanes = cand
            break

    if lanes is not None:
        y = _relu_slab(xf, lanes, sublane, itemsize, donate=donate)
        return y.reshape(orig_shape)

    # Truly ragged total: kernel over the 128-aligned prefix; handle the
    # (<128-element) tail with a plain VPU max outside the kernel.
    lanes = 128
    main = (total // lanes) * lanes
    if main == 0:
        # Fewer than 128 elements — not worth a kernel launch.
        return jnp.maximum(xf, 0).reshape(orig_shape)
    y_main = _relu_slab(xf[:main], lanes, sublane, itemsize, donate=False)
    y_tail = jnp.maximum(xf[main:], 0)
    return jnp.concatenate([y_main, y_tail]).reshape(orig_shape)


# TODO(synk): qat=True paths (QuantReLU / IQuantReLU fake-quant wrappers) are
# not implemented; only the default nn.ReLU path of qrelu is translated.

if __name__ == "__main__":
    key = jax.random.PRNGKey(0)

    # Small NCHW activation consistent with the module: (N=2, C=4, H=16, W=16).
    x = jax.random.normal(key, (2, 4, 16, 16), dtype=jnp.float32)
    y = qrelu_forward(x)
    jax.block_until_ready(y)
    y_ref = jnp.maximum(x, 0.0)
    assert y.shape == x.shape and y.dtype == x.dtype
    assert bool(jnp.allclose(y, y_ref)), "mismatch vs reference ReLU"

    # Ragged-size sanity check (exercises the prefix-kernel + tail path).
    x2 = jax.random.normal(jax.random.PRNGKey(1), (2, 131), dtype=jnp.float32)
    y2 = qrelu_forward(x2)
    jax.block_until_ready(y2)
    assert bool(jnp.allclose(y2, jnp.maximum(x2, 0.0))), "mismatch (ragged)"

    print("KERNEL_OK")
</pallas_src>

<mosaic_0001>
module attributes {stable_mosaic.version = 11 : i64} {
  func.func @_relu_kernel(%arg0: i32, %arg1: memref<2x1024xf32, #tpu.memory_space<vmem>>, %arg2: memref<2x1024xf32, #tpu.memory_space<vmem>>) attributes {dimension_semantics = [#tpu.dimension_semantics<parallel>], iteration_bounds = array<i64: 1>, scalar_prefetch = 0 : i64, scratch_operands = 0 : i64, tpu.core_type = #tpu.core_type<tc>, window_params = [{transform_indices = @transform_0, window_bounds = array<i64: 2, 1024>}, {transform_indices = @transform_1, window_bounds = array<i64: 2, 1024>}]} {
    %c0 = arith.constant 0 : index
    %c0_0 = arith.constant 0 : index
    %0 = vector.load %arg1[%c0, %c0_0] : memref<2x1024xf32, #tpu.memory_space<vmem>>, vector<2x1024xf32>
    %cst = arith.constant 0.000000e+00 : f32
    %1 = vector.broadcast %cst : f32 to vector<2x1024xf32>
    %2 = arith.maximumf %0, %1 : vector<2x1024xf32>
    %c0_1 = arith.constant 0 : index
    %c0_2 = arith.constant 0 : index
    %3 = vector.load %arg2[%c0_1, %c0_2] : memref<2x1024xf32, #tpu.memory_space<vmem>>, vector<2x1024xf32>
    tpu.vector_store %arg2[%c0_1, %c0_2], %2 {strides = array<i32>} : memref<2x1024xf32, #tpu.memory_space<vmem>>, vector<2x1024xf32>,
    return
  }
  func.func @transform_0(%arg0: i32) -> (i32, i32) {
    %c0_i32 = arith.constant 0 : i32
    %c0_i32_0 = arith.constant 0 : i32
    return %arg0, %c0_i32 : i32, i32
  }
  func.func @transform_1(%arg0: i32) -> (i32, i32) {
    %c0_i32 = arith.constant 0 : i32
    %c0_i32_0 = arith.constant 0 : i32
    return %arg0, %c0_i32 : i32, i32
  }
}

</mosaic_0001>

<bundles_post_ra>
// kernel: tpu_custom_call.1
= control target key start
LH: loop header
LB: loop body
LE: loop exit
PB: predicated region body
PF: predicated region fallthrough
CT: control target
= control target key end

     0   :  { %6 = vsyncpa [#allocation3], 0  ;;  %s106_s0 = inlined_call_operand.hbm [shape: f32[2,1024], index: 0, kind: input, shape index: {}]   ;;  %s107_s1 = inlined_call_operand.hbm [shape: f32[2,1024], index: 1, kind: output, shape index: {}]  }
   0x1   :  { %7 = vsyncpa [#allocation4], 0  ;;  %s88_s6 = smov [#allocation2]  }
   0x2   :  { %s14_s7 = sshll.u32 %s88_s6, 4  ;;  %s15_s7 = int_to_ptr.vmem [resolvable:$true] %s14_s7 }
   0x3   :  { %s52_s8 = scalar_lea.vmem %s15_s7, 256  ;;  %p57_p1 = scmp.lt.s32.totalorder %s15_s7, %s15_s7 }
   0x4   :  { %p53_p0 = scmp.ne.s32.totalorder %s15_s7, %s52_s8  ;;  %p58_p2 = scmp.lt.s32.totalorder %s52_s8, %s52_s8 }
   0x6   :  { %p59_p3 = por %p58_p2, %p57_p1 }
   0x8   :  { %p60_p4 = pnand %p59_p3, %p53_p0 }
   0xa   :  { %63 = shalt.err (!%p60_p4)
}
   0xb   :  { %17 = dma.hbm_to_vmem [thread:$0]  %s106_s0, 256, %s15_s7, [#allocation3]  }
   0xc   :  { %84 = dma.done.wait [#allocation3], 256  }
   0xd   :  { %85 = vsyncadd [#allocation3], 4294967040  ;;  %s89_s11 = smov [#allocation5]   ;;  %v21_v0 = vld [vmem:[#allocation2] sm:$0xff]  ;;  %v22_v1 = vld [vmem:[#allocation2 + $0x8] sm:$0xff] }
   0xe   :  { %s33_s12 = sshll.u32 %s89_s11, 4  ;;  %v23_v2 = vmax.f32 %v21_v0, 0.0  ;;  %v24_v3 = vmax.f32 %v22_v1, 0.0  ;;  %s34_s12 = int_to_ptr.vmem [resolvable:$true] %s33_s12 }
   0xf   :  { %s64_s13 = scalar_lea.vmem %s34_s12, 256  ;;  %p69_p6 = scmp.lt.s32.totalorder %s34_s12, %s34_s12 }
  0x10   :  { %25 = vst [vmem:[#allocation5] sm:$0xff] %v23_v2  ;;  %26 = vst [vmem:[#allocation5 + $0x8] sm:$0xff] %v24_v3  ;;  %p65_p5 = scmp.ne.s32.totalorder %s34_s12, %s64_s13  ;;  %p70_p7 = scmp.lt.s32.totalorder %s64_s13, %s64_s13 }
  0x12   :  { %p71_p8 = por %p70_p7, %p69_p6 }
  0x14   :  { %p72_p9 = pnand %p71_p8, %p65_p5 }
  0x16   :  { %75 = shalt.err (!%p72_p9)
}
  0x17   :  { %36 = dma.vmem_to_hbm [thread:$0]  %s34_s12, 256, %s107_s1, [#allocation4]  }
  0x18   :  { %86 = dma.done.wait [#allocation4], 256  }
  0x19   :  { %87 = vsyncadd [#allocation4], 4294967040 }
  0x1a   :  { %40 = vsyncpa [#allocation3], 1 }
  0x1b   :  { %41 = vsyncpa [#allocation4], 1 }

</bundles_post_ra>
